<compile_context>
chip_gen: v7x
topology: tpu7x:2x2x1
jax: 0.10.0
libtpu: 0.0.40
codegen_flags: <defaults>
</compile_context>

<pallas_src>
import math

import jax
import jax.numpy as jnp
import numpy as np
from jax.experimental import pallas as pl
from jax.experimental.pallas import tpu as pltpu


def _round_up(x: int, m: int) -> int:
    return ((x + m - 1) // m) * m


def _make_head_compression_kernel(remain_k: int, seq_len: int):
    """Kernel closed over the static k and the *logical* sequence length."""
    # Hillis-Steele offsets: the prefix sum only has to be exact for the first
    # `seq_len` (un-padded) columns, so ceil(log2(seq_len)) steps suffice even
    # though the kernel operates on the 128-padded width.
    shifts = []
    d = 1
    while d < seq_len:
        shifts.append(d)
        d *= 2

    def kernel(tok_ref, out_ref):
        tok = tok_ref[...]                       # (TB, S_pad) int32
        tb, s_pad = tok.shape
        mask = (tok > 0).astype(jnp.int32)       # padded cols are 0 by construction

        col = jax.lax.broadcasted_iota(jnp.int32, (tb, s_pad), 1)

        # Inclusive prefix sum P[b, j] = sum_{i <= j} mask[b, i] along lanes.
        # Each step: one XLU roll + one masked VPU add (circular wrap zeroed).
        p = mask
        for d in shifts:                         # static python loop (unrolled)
            shifted = pltpu.roll(p, shift=d, axis=1)
            p = p + jnp.where(col >= d, shifted, 0)

        # Per-row total of kept tokens (lane reduce), then suffix count.
        t = jnp.sum(mask, axis=1, keepdims=True)  # (TB, 1)
        s = t - p                                 # s[b, j] = #{ i > j : mask }

        # rank: masked j -> 1 + s ; unmasked j -> j + s ; column 0 always kept
        # (it is the forced global minimum, and remain_k >= 1).
        rank = jnp.where(mask > 0, 1 + s, col + s)
        keep = jnp.logical_or(rank < remain_k, col == 0)

        # Narrow, lane-dense writeback (bool cast happens in the wrapper).
        out_ref[...] = keep.astype(jnp.int8)

    return kernel


def head_compression_forward(token_sequence, embedding_sequence, compression_rate):
    """JAX/Pallas equivalent of HeadCompressionModule.forward.

    `compression_rate` must be a static Python number (trace-time int(), exactly
    like the PyTorch module's int(S * (1 - rate))).
    """
    B, S = embedding_sequence.shape[0], embedding_sequence.shape[1]
    assert token_sequence.shape[0] == B and token_sequence.shape[1] == S

    remain_k = max(int(S * (1.0 - compression_rate)), 1)

    tok = token_sequence.astype(jnp.int32)

    # Pad the sequence axis to a multiple of 128: lane-dense unmasked stores and
    # lane-aligned rolls. Padded columns read token 0 -> mask False -> they never
    # affect the first S columns, and are sliced off below.
    s_pad = _round_up(max(S, 1), 128)
    if s_pad != S:
        tok = jnp.pad(tok, ((0, 0), (0, s_pad - S)))

    # Batch tiling: rows are independent. Tile is a multiple of 32 (int8 native
    # (32,128) tile) and the grid gets >= 2 steps when B > 32 so both v7x
    # TensorCores get work and the DMA pipeline has something to overlap.
    # For tiny B a single full-array block is always legal.
    if B <= 32:
        tb = B
    else:
        tb = min(256, _round_up(pl.cdiv(B, 2), 32))
    grid = (pl.cdiv(B, tb),)
    # NOTE: when B % tb != 0 the last block computes on OOB-padded garbage rows;
    # rows are independent and Pallas masks the OOB writeback, so valid output
    # is unaffected. Intentional -- keeps the pipeline simple.

    n_steps = max(1, math.ceil(math.log2(max(S, 2))))
    cost = pl.CostEstimate(
        flops=int(B * s_pad * (3 * n_steps + 8)),
        transcendentals=0,
        bytes_accessed=int(B * s_pad * (4 + 1)),
    )

    y_hard_i8 = pl.pallas_call(
        _make_head_compression_kernel(remain_k, S),
        out_shape=jax.ShapeDtypeStruct((B, s_pad), jnp.int8),
        grid=grid,
        in_specs=[pl.BlockSpec((tb, s_pad), lambda b: (b, 0))],
        out_specs=pl.BlockSpec((tb, s_pad), lambda b: (b, 0)),
        compiler_params=pltpu.CompilerParams(
            dimension_semantics=("parallel",),
        ),
        cost_estimate=cost,
    )(tok)

    y_hard = y_hard_i8[:, :S].astype(jnp.bool_)
    return (y_hard, y_hard)


def _reference_numpy(token_sequence, embedding_sequence, compression_rate):
    """Pure-numpy reference reproducing the PyTorch module (stable tie-break)."""
    tok = np.asarray(token_sequence)
    B, S = embedding_sequence.shape[0], embedding_sequence.shape[1]
    remain_k = max(int(S * (1.0 - compression_rate)), 1)

    mask = (tok > 0).astype(np.int64)
    pos = -np.arange(1, S + 1, dtype=np.int64)[None, :].repeat(B, axis=0)
    pos = pos * mask

    y_soft = pos.copy()
    y_soft[:, 0] = y_soft.min() - 1
    sorted_idx = np.argsort(y_soft, axis=1, kind="stable")
    rank = np.argsort(sorted_idx, axis=1, kind="stable")
    y_hard = rank < remain_k
    return y_hard


if __name__ == "__main__":
    key = jax.random.PRNGKey(0)
    B, S, H = 2, 8, 32

    k_tok, k_emb = jax.random.split(key)
    # Integer tokens with some padding zeros (simulates a padded batch).
    token_sequence = jax.random.randint(k_tok, (B, S), minval=0, maxval=100, dtype=jnp.int32)
    token_sequence = token_sequence.at[0, 6:].set(0)   # pad tail of row 0
    token_sequence = token_sequence.at[1, 4:].set(0)   # pad tail of row 1

    embedding_sequence = jax.random.normal(k_emb, (B, S, H), dtype=jnp.float32)
    compression_rate = 0.5

    y_hard, y_hard2 = head_compression_forward(
        token_sequence, embedding_sequence, compression_rate
    )
    jax.block_until_ready(y_hard)

    ref = _reference_numpy(np.array(token_sequence), np.zeros((B, S, H)), compression_rate)
    assert np.array_equal(np.array(y_hard), ref), (np.array(y_hard), ref)
    assert np.array_equal(np.array(y_hard2), ref)

    print("KERNEL_OK")
</pallas_src>

<mosaic_0001>
module attributes {stable_mosaic.version = 11 : i64} {
  func.func @kernel(%arg0: i32, %arg1: memref<2x128xi32, #tpu.memory_space<vmem>>, %arg2: memref<2x128xi8, #tpu.memory_space<vmem>>) attributes {dimension_semantics = [#tpu.dimension_semantics<parallel>], iteration_bounds = array<i64: 1>, scalar_prefetch = 0 : i64, scratch_operands = 0 : i64, tpu.core_type = #tpu.core_type<tc>, window_params = [{transform_indices = @transform_0, window_bounds = array<i64: 2, 128>}, {transform_indices = @transform_1, window_bounds = array<i64: 2, 128>}]} {
    %c0 = arith.constant 0 : index
    %c0_0 = arith.constant 0 : index
    %0 = vector.load %arg1[%c0, %c0_0] : memref<2x128xi32, #tpu.memory_space<vmem>>, vector<2x128xi32>
    %c0_i32 = arith.constant 0 : i32
    %1 = vector.broadcast %c0_i32 : i32 to vector<2x128xi32>
    %2 = arith.cmpi sgt, %0, %1 : vector<2x128xi32>
    %3 = arith.extui %2 : vector<2x128xi1> to vector<2x128xi32>
    %4 = tpu.iota {dimensions = array<i32: 1>} : vector<2x128xi32>
    %c1_i32 = arith.constant 1 : i32
    %5 = tpu.dynamic_rotate %3 by %c1_i32 dim 1 : vector<2x128xi32>, i32 -> vector<2x128xi32>
    %c1_i32_1 = arith.constant 1 : i32
    %6 = vector.broadcast %c1_i32_1 : i32 to vector<2x128xi32>
    %7 = arith.cmpi sge, %4, %6 : vector<2x128xi32>
    %c0_i32_2 = arith.constant 0 : i32
    %8 = vector.broadcast %c0_i32_2 : i32 to vector<2x128xi32>
    %9 = arith.select %7, %5, %8 : vector<2x128xi1>, vector<2x128xi32>
    %10 = arith.addi %3, %9 : vector<2x128xi32>
    %c2_i32 = arith.constant 2 : i32
    %11 = tpu.dynamic_rotate %10 by %c2_i32 dim 1 : vector<2x128xi32>, i32 -> vector<2x128xi32>
    %c2_i32_3 = arith.constant 2 : i32
    %12 = vector.broadcast %c2_i32_3 : i32 to vector<2x128xi32>
    %13 = arith.cmpi sge, %4, %12 : vector<2x128xi32>
    %c0_i32_4 = arith.constant 0 : i32
    %14 = vector.broadcast %c0_i32_4 : i32 to vector<2x128xi32>
    %15 = arith.select %13, %11, %14 : vector<2x128xi1>, vector<2x128xi32>
    %16 = arith.addi %10, %15 : vector<2x128xi32>
    %c4_i32 = arith.constant 4 : i32
    %17 = tpu.dynamic_rotate %16 by %c4_i32 dim 1 : vector<2x128xi32>, i32 -> vector<2x128xi32>
    %c4_i32_5 = arith.constant 4 : i32
    %18 = vector.broadcast %c4_i32_5 : i32 to vector<2x128xi32>
    %19 = arith.cmpi sge, %4, %18 : vector<2x128xi32>
    %c0_i32_6 = arith.constant 0 : i32
    %20 = vector.broadcast %c0_i32_6 : i32 to vector<2x128xi32>
    %21 = arith.select %19, %17, %20 : vector<2x128xi1>, vector<2x128xi32>
    %22 = arith.addi %16, %21 : vector<2x128xi32>
    %cst = arith.constant dense<0> : vector<2xi32>
    %23 = vector.multi_reduction <add>, %3, %cst [1] : vector<2x128xi32> to vector<2xi32>
    %24 = vector.shape_cast %23 : vector<2xi32> to vector<2x1xi32>
    %25 = vector.broadcast %24 : vector<2x1xi32> to vector<2x128xi32>
    %26 = arith.subi %25, %22 : vector<2x128xi32>
    %c0_i32_7 = arith.constant 0 : i32
    %27 = vector.broadcast %c0_i32_7 : i32 to vector<2x128xi32>
    %28 = arith.cmpi sgt, %3, %27 : vector<2x128xi32>
    %c1_i32_8 = arith.constant 1 : i32
    %29 = vector.broadcast %c1_i32_8 : i32 to vector<2x128xi32>
    %30 = arith.addi %29, %26 : vector<2x128xi32>
    %31 = arith.addi %4, %26 : vector<2x128xi32>
    %32 = arith.select %28, %30, %31 : vector<2x128xi1>, vector<2x128xi32>
    %c4_i32_9 = arith.constant 4 : i32
    %33 = vector.broadcast %c4_i32_9 : i32 to vector<2x128xi32>
    %34 = arith.cmpi slt, %32, %33 : vector<2x128xi32>
    %c0_i32_10 = arith.constant 0 : i32
    %35 = vector.broadcast %c0_i32_10 : i32 to vector<2x128xi32>
    %36 = arith.cmpi eq, %4, %35 : vector<2x128xi32>
    %37 = arith.ori %34, %36 : vector<2x128xi1>
    %38 = arith.extui %37 : vector<2x128xi1> to vector<2x128xi8>
    %c0_11 = arith.constant 0 : index
    %c0_12 = arith.constant 0 : index
    %39 = vector.load %arg2[%c0_11, %c0_12] : memref<2x128xi8, #tpu.memory_space<vmem>>, vector<2x128xi8>
    tpu.vector_store %arg2[%c0_11, %c0_12], %38 {strides = array<i32>} : memref<2x128xi8, #tpu.memory_space<vmem>>, vector<2x128xi8>,
    return
  }
  func.func @transform_0(%arg0: i32) -> (i32, i32) {
    %c0_i32 = arith.constant 0 : i32
    %c0_i32_0 = arith.constant 0 : i32
    return %arg0, %c0_i32 : i32, i32
  }
  func.func @transform_1(%arg0: i32) -> (i32, i32) {
    %c0_i32 = arith.constant 0 : i32
    %c0_i32_0 = arith.constant 0 : i32
    return %arg0, %c0_i32 : i32, i32
  }
}

</mosaic_0001>

<bundles_post_ra>
// kernel: tpu_custom_call.1
= control target key start
LH: loop header
LB: loop body
LE: loop exit
PB: predicated region body
PF: predicated region fallthrough
CT: control target
= control target key end

     0   :  { %6 = vsyncpa [#allocation3], 0  ;;  %s185_s0 = inlined_call_operand.hbm [shape: s32[2,128], index: 0, kind: input, shape index: {}]   ;;  %s186_s1 = inlined_call_operand.hbm [shape: s8[2,128], index: 1, kind: output, shape index: {}]  }
   0x1   :  { %7 = vsyncpa [#allocation4], 0  ;;  %s143_s6 = smov [#allocation2]   ;;  %s95_s10 = scalar_lea.hbm %s185_s0, 32 }
   0x2   :  { %s14_s7 = sshll.u32 %s143_s6, 4  ;;  %p96_p0 = scmp.ne.s32.totalorder %s185_s0, %s95_s10  ;;  %s15_s7 = int_to_ptr.vmem [resolvable:$true] %s14_s7 }
   0x3   :  { %p99_p1 = scmp.lt.u32.totalorder %s95_s10, %s185_s0 }
   0x5   :  { %p101_p2 = pnand %p99_p1, %p96_p0 }
   0x7   :  { %104 = shalt.err (!%p101_p2)
}
   0x8   :  { %s105_s15 = scalar_lea.vmem %s15_s7, 32  ;;  %p110_p4 = scmp.lt.s32.totalorder %s15_s7, %s15_s7 }
   0x9   :  { %p106_p3 = scmp.ne.s32.totalorder %s15_s7, %s105_s15  ;;  %p111_p5 = scmp.lt.s32.totalorder %s105_s15, %s105_s15 }
   0xb   :  { %p112_p6 = por %p111_p5, %p110_p4 }
   0xd   :  { %p113_p7 = pnand %p112_p6, %p106_p3 }
   0xf   :  { %116 = shalt.err (!%p113_p7)
}
  0x10   :  { %17 = dma.hbm_to_vmem [thread:$0]  %s185_s0, 32, %s15_s7, [#allocation3]  }
  0x11   :  { %139 = dma.done.wait [#allocation3], 32  }
  0x12   :  { %140 = vsyncadd [#allocation3], 4294967264  ;;  %v23_v0 = vld [vmem:[#allocation2] sm:$0x3]  ;;  %vm43_vm0 = vcmask 1041408   ;;  %v144_v1 = vmov 0   ;;  %v26_v8 = vlaneseq }
  0x13   :  { %vm24_vm1 = vcmp.gt.s32.totalorder %v23_v0, 0  ;;  %s145_s18 = smov 1   ;;  %s146_s0 = smov 2   ;;  %vm68_vm5 = vcmask 1040384   ;;  %vm69_vm6 = vsmask.f32 256 }
  0x14   :  { %v25_v2 = vsel %vm24_vm1, 1, %v144_v1  ;;  %v27_v9 = vand.u32 127, %v26_v8  ;;  %s147_s19 = smov 4   ;;  %vm70_vm9 = vmand %vm68_vm5, %vm69_vm6  ;;  %s148_s20 = smov [#allocation5]   ;;  %v71_v29 = vld [vmem:[#allocation5] sm:$0x1] }
  0x15   :  { %28 = vrot.lane.b32.xlu0 %v25_v2, %s145_s18  ;;  %v44_v3 = vsel %vm43_vm0, %v25_v2, 0  ;;  %s80_s21 = sshll.u32 %s148_s20, 4  ;;  %s81_s21 = int_to_ptr.vmem [resolvable:$true] %s80_s21 }
  0x16   :  { %v46_v4 = vshrl.u32 %v44_v3, 16  ;;  %v45_v5 = vand.u32 65535, %v44_v3  ;;  %vm30_vm2 = vcmp.ge.s32.totalorder %v27_v9, 1  ;;  %vm35_vm3 = vcmp.ge.s32.totalorder %v27_v9, 2  ;;  %s117_s22 = scalar_lea.vmem %s81_s21, 16  ;;  %s121_s23 = scalar_lea.vmem %s81_s21, 32 }
  0x17   :  { %vm40_vm4 = vcmp.ge.s32.totalorder %v27_v9, 4  ;;  %vm63_vm7 = vcmp.eq.s32.totalorder %v27_v9, 0  ;;  %p118_p8 = scmp.ne.s32.totalorder %s81_s21, %s117_s22  ;;  %p122_p9 = scmp.lt.s32.totalorder %s81_s21, %s81_s21 }
  0x18   :  { %v48_v6 = vcvt.s32.f32 %v46_v4  ;;  %v47_v7 = vcvt.s32.f32 %v45_v5  ;;  %p123_p10 = scmp.lt.s32.totalorder %s121_s23, %s117_s22 }
  0x1a   :  { %51 = vadd.xlane.f32.xlu1 %v48_v6  ;;  %p124_p11 = por %p123_p10, %p122_p9 }
  0x1c   :  { %p125_p12 = pnand %p124_p11, %p118_p8 }
  0x1e   :  { %49 = vadd.xlane.f32.xlu1 %v47_v7 }
  0x87   :  { %v29_v10 = vpop.permute.xlu0 %28 }
  0x88   :  { %v31_v11 = vsel %vm30_vm2, %v29_v10, 0 }
  0x89   :  { %v32_v12 = vadd.s32 %v31_v11, %v25_v2 }
  0x8b   :  { %33 = vrot.lane.b32.xlu0 %v32_v12, %s146_s0 }
  0xa7   :  { %v52_v16 = vpop.xlane.xlu1 %51 }
  0xa8   :  { %v54_v17 = vcvt.f32.s32 %v52_v16 }
  0xaa   :  { %v55_v19 = vshll.u32 %v54_v17, 16 }
  0xab   :  { %v50_v18 = vpop.xlane.xlu1 %49 }
  0xac   :  { %v53_v20 = vcvt.f32.s32 %v50_v18 }
  0xae   :  { %v56_v23 = vadd.s32 %v55_v19, %v53_v20 }
  0xfd   :  { %v34_v13 = vpop.permute.xlu0 %33 }
  0xfe   :  { %v36_v14 = vsel %vm35_vm3, %v34_v13, 0 }
  0xff   :  { %v37_v15 = vadd.s32 %v36_v14, %v32_v12 }
 0x101   :  { %38 = vrot.lane.b32.xlu0 %v37_v15, %s147_s19 }
 0x173   :  { %v39_v21 = vpop.permute.xlu0 %38 }
 0x174   :  { %v41_v22 = vsel %vm40_vm4, %v39_v21, 0 }
 0x175   :  { %v42_v24 = vadd.s32 %v41_v22, %v37_v15 }
 0x177   :  { %v57_v25 = vsub.s32 %v56_v23, %v42_v24 }
 0x179   :  { %v59_v26 = vadd.s32 1, %v57_v25  ;;  %v60_v27 = vadd.s32 %v57_v25, %v27_v9 }
 0x17b   :  { %v61_v28 = vsel %vm24_vm1, %v59_v26, %v60_v27 }
 0x17c   :  { %vm62_vm8 = vcmp.lt.s32.totalorder %v61_v28, 4 }
 0x17d   :  { %vm64_vm10 = vmor %vm62_vm8, %vm63_vm7 }
 0x17e   :  { %vm65_vm11 = vmpackc.low %vm64_vm10, %vm64_vm10 }
 0x17f   :  { %vm66_vm12 = vmpackc.even %vm65_vm11, %vm65_vm11 }
 0x180   :  { %v67_v30 = vsel %vm66_vm12, 16843009, %v144_v1 }
 0x181   :  { %v72_v31 = vsel %vm70_vm9, %v67_v30, %v71_v29 }
 0x182   :  { %73 = vst [vmem:[#allocation5] sm:$0x1] %v72_v31 }
 0x183   :  { %128 = shalt.err (!%p125_p12)
}
 0x184   :  { %s129_s26 = scalar_lea.hbm %s186_s1, 16 }
 0x185   :  { %p130_p13 = scmp.ne.s32.totalorder %s186_s1, %s129_s26  ;;  %p133_p0 = scmp.lt.u32.totalorder %s129_s26, %s186_s1 }
 0x187   :  { %p135_p1 = pnand %p133_p0, %p130_p13 }
 0x189   :  { %138 = shalt.err (!%p135_p1)
}
 0x18a   :  { %83 = dma.vmem_to_hbm [thread:$0]  %s81_s21, 16, %s186_s1, [#allocation4]  }
 0x18b   :  { %141 = dma.done.wait [#allocation4], 16  }
 0x18c   :  { %142 = vsyncadd [#allocation4], 4294967280 }
 0x18d   :  { %87 = vsyncpa [#allocation3], 1 }
 0x18e   :  { %88 = vsyncpa [#allocation4], 1 }

</bundles_post_ra>
